<compile_context>
chip_gen: v7x
topology: tpu7x:2x2x1
jax: 0.10.0
libtpu: 0.0.40
codegen_flags: <defaults>
</compile_context>

<pallas_src>
import jax
import jax.numpy as jnp
from jax.experimental import pallas as pl
from jax.experimental.pallas import tpu as pltpu

_LANE = 128
# MXU/lane-aligned tile candidates (512 works for v5e 4x128^2 and v6e/v7x 2x256^2).
_TILE_CANDIDATES = (2048, 1024, 512, 256, 128)


def _make_mlp_kernel_t(num_layers: int, relu_last: bool = True):
    """Transposed MLP kernel: activations are (features, batch), batch on lanes.

    Layer 0 avoids the lane-axis concat:
        h0^T = W0a^T @ e1^T + W0b^T @ e2^T + b0^T
    (the W0 split and all weight transposes are done once in the wrapper).
    """

    def kernel(e1t_ref, e2t_ref, *refs):
        # refs = (w0a_t, w0b_t, b0_t, w1_t, b1_t, ..., out_ref)
        out_ref = refs[-1]
        params = refs[:-1]

        w0a_t = params[0][...]                        # (H0, P)
        w0b_t = params[1][...]                        # (H0, P)
        b0_t = params[2][...].astype(jnp.float32)     # (H0, 1)

        x = (
            jnp.dot(w0a_t, e1t_ref[...].astype(w0a_t.dtype),
                    preferred_element_type=jnp.float32)
            + jnp.dot(w0b_t, e2t_ref[...].astype(w0b_t.dtype),
                      preferred_element_type=jnp.float32)
            + b0_t
        )
        if num_layers > 1 or relu_last:
            x = jnp.maximum(x, 0.0)

        idx = 3
        for layer in range(1, num_layers):
            wt = params[idx][...]                          # (out, in)
            bt = params[idx + 1][...].astype(jnp.float32)  # (out, 1)
            idx += 2
            # MXU consumes the weights' storage dtype (bf16 native); keep the
            # accumulator, bias add and ReLU in f32.
            x = jnp.dot(wt, x.astype(wt.dtype),
                        preferred_element_type=jnp.float32) + bt
            if layer < num_layers - 1 or relu_last:
                x = jnp.maximum(x, 0.0)

        out_ref[...] = x.astype(out_ref.dtype)

    return kernel


def _choose_batch_tile(batch):
    """Largest MXU/lane-aligned tile that still yields >= 2 grid steps.

    >= 2 steps keeps dimension_semantics=("parallel",) meaningful on v7x
    (2 TensorCores); an even step count also avoids a straggler step.
    """
    for cand in _TILE_CANDIDATES:
        if batch % cand == 0 and batch // cand >= 2:
            return cand
    return None


def path_prediction_forward(embed_1, embed_2, weights, biases,
                            relu_last=True, batch_tile=None):
    """Fused concat + MLP forward via a single pallas_call.

    Layout: the batch axis is placed on lanes inside the kernel (out^T = W^T x^T);
    inputs/outputs keep the module's (batch, features) layout at the interface.
    batch_tile=None -> auto: tiled (streaming, weights resident) whenever a
    128-multiple tile with >= 2 grid steps divides the batch, else grid-less.
    """
    assert len(weights) == len(biases) and len(weights) >= 1
    num_layers = len(weights)
    batch, proj_dim = embed_1.shape
    assert embed_2.shape == (batch, proj_dim)
    assert weights[0].shape[0] == 2 * proj_dim
    out_dim = weights[-1].shape[1]
    out_dtype = embed_1.dtype

    # Wrapper-side layout plumbing (static / XLA): batch on lanes, W0 split,
    # weights pre-transposed, biases as (out, 1) columns.
    e1t = embed_1.T                               # (P, B)
    e2t = embed_2.T                               # (P, B)
    w0a_t = weights[0][:proj_dim, :].T            # (H0, P)
    w0b_t = weights[0][proj_dim:, :].T            # (H0, P)
    param_ops = [w0a_t, w0b_t, biases[0].reshape(-1, 1)]
    for w, b in zip(weights[1:], biases[1:]):
        param_ops += [w.T, b.reshape(-1, 1)]

    kernel = _make_mlp_kernel_t(num_layers, relu_last=relu_last)

    # Advisory cost estimate: flops = 2*B*sum(K_i*N_i); bytes = params + acts.
    flops = 0
    bytes_accessed = 0
    for w, b in zip(weights, biases):
        flops += 2 * batch * w.shape[0] * w.shape[1]
        bytes_accessed += w.size * w.dtype.itemsize + b.size * b.dtype.itemsize
    bytes_accessed += (embed_1.size * embed_1.dtype.itemsize
                       + embed_2.size * embed_2.dtype.itemsize
                       + batch * out_dim * jnp.dtype(out_dtype).itemsize)
    cost = pl.CostEstimate(flops=flops, transcendentals=0,
                           bytes_accessed=bytes_accessed)

    out_shape_t = jax.ShapeDtypeStruct((out_dim, batch), out_dtype)

    if batch_tile is None:
        batch_tile = _choose_batch_tile(batch)
    else:
        assert batch % batch_tile == 0, "batch must be a multiple of batch_tile"
        assert batch_tile % _LANE == 0, "batch_tile must be a multiple of 128 (lane)"

    if batch_tile is None:
        # Grid-less path (tiny / non-tileable batches): everything resident in
        # VMEM, no pipelining machinery.  Guard the default scoped-VMEM limit
        # (16 MiB v5e / 32 MiB v6e,v7x) in case of a large non-tileable batch.
        resident_bytes = sum(int(p.size) * p.dtype.itemsize
                             for p in (e1t, e2t, *param_ops))
        resident_bytes += batch * out_dim * jnp.dtype(out_dtype).itemsize
        compiler_params = None
        if resident_bytes > (8 << 20):
            compiler_params = pltpu.CompilerParams(
                vmem_limit_bytes=min(4 * resident_bytes + (8 << 20), 100 << 20))
        vmem = pl.BlockSpec(memory_space=pltpu.MemorySpace.VMEM)
        out_t = pl.pallas_call(
            kernel,
            out_shape=out_shape_t,
            in_specs=[vmem] * (2 + len(param_ops)),
            out_specs=vmem,
            cost_estimate=cost,
            compiler_params=compiler_params,
        )(e1t, e2t, *param_ops)
        return out_t.T

    # Batch-tiled path: only the activations stream (lane axis = batch);
    # weights/biases stay resident via index_maps returning block (0, 0).
    grid = (batch // batch_tile,)
    in_specs = [
        pl.BlockSpec((proj_dim, batch_tile), lambda i: (0, i)),
        pl.BlockSpec((proj_dim, batch_tile), lambda i: (0, i)),
    ] + [pl.BlockSpec(p.shape, lambda i: (0, 0)) for p in param_ops]
    out_specs = pl.BlockSpec((out_dim, batch_tile), lambda i: (0, i))

    out_t = pl.pallas_call(
        kernel,
        out_shape=out_shape_t,
        grid=grid,
        in_specs=in_specs,
        out_specs=out_specs,
        cost_estimate=cost,
        compiler_params=pltpu.CompilerParams(
            # Independent batch tiles -> shard grid steps across TCs (v7x).
            dimension_semantics=("parallel",),
        ),
    )(e1t, e2t, *param_ops)
    return out_t.T


def init_path_prediction_params(key, projection_dim, path_embedding_dim,
                                hidden_sizes, dtype=jnp.float32):
    """Deterministic parameter init matching the torch module's layer sizes."""
    sizes = [projection_dim * 2] + list(hidden_sizes) + [path_embedding_dim]
    weights, biases = [], []
    for fan_in, fan_out in zip(sizes[:-1], sizes[1:]):
        key, wk, bk = jax.random.split(key, 3)
        scale = 1.0 / jnp.sqrt(jnp.asarray(fan_in, dtype=jnp.float32))
        w = jax.random.uniform(wk, (fan_in, fan_out), dtype=jnp.float32,
                               minval=-scale, maxval=scale).astype(dtype)
        b = jax.random.uniform(bk, (1, fan_out), dtype=jnp.float32,
                               minval=-scale, maxval=scale).astype(dtype)
        weights.append(w)
        biases.append(b)
    return weights, biases


def path_prediction_reference(embed_1, embed_2, weights, biases,
                              relu_last=True):
    """Plain-JAX f32 reference for correctness checking."""
    x = jnp.concatenate([embed_1, embed_2], axis=1).astype(jnp.float32)
    n = len(weights)
    for i, (w, b) in enumerate(zip(weights, biases)):
        x = x @ w.astype(jnp.float32) + b.astype(jnp.float32)
        if i < n - 1 or relu_last:
            x = jnp.maximum(x, 0.0)
    return x.astype(embed_1.dtype)


if __name__ == "__main__":
    projection_dim = 16
    path_embedding_dim = 16
    hidden_sizes = [32, 32]
    relu_last = True  # layer_norm=False (default path)

    key = jax.random.PRNGKey(0)
    k1, k2, kp = jax.random.split(key, 3)

    weights, biases = init_path_prediction_params(
        kp, projection_dim, path_embedding_dim, hidden_sizes)

    # 1) Small batch -> auto grid-less full-VMEM path (f32).
    batch = 8
    embed_1 = jax.random.normal(k1, (batch, projection_dim), dtype=jnp.float32)
    embed_2 = jax.random.normal(k2, (batch, projection_dim), dtype=jnp.float32)

    out = path_prediction_forward(embed_1, embed_2, weights, biases,
                                  relu_last=relu_last)
    out = jax.block_until_ready(out)
    ref = path_prediction_reference(embed_1, embed_2, weights, biases,
                                    relu_last=relu_last)
    assert out.shape == (batch, path_embedding_dim)
    assert jnp.allclose(out, ref, atol=1e-5, rtol=1e-5), "mismatch (gridless)"

    # 2) Larger batch -> auto batch-tiled path (tile=512, grid=2, batch on lanes).
    batch_big = 1024
    e1b = jax.random.normal(k1, (batch_big, projection_dim), dtype=jnp.float32)
    e2b = jax.random.normal(k2, (batch_big, projection_dim), dtype=jnp.float32)
    out_t = path_prediction_forward(e1b, e2b, weights, biases,
                                    relu_last=relu_last)
    out_t = jax.block_until_ready(out_t)
    ref_t = path_prediction_reference(e1b, e2b, weights, biases,
                                      relu_last=relu_last)
    assert out_t.shape == (batch_big, path_embedding_dim)
    assert jnp.allclose(out_t, ref_t, atol=1e-5, rtol=1e-5), "mismatch (tiled)"

    # 3) bf16-weight storage path (inputs cast to bf16 per-dot, f32 accumulate),
    #    looser tolerance by design.
    w_bf16 = [w.astype(jnp.bfloat16) for w in weights]
    b_bf16 = [b.astype(jnp.bfloat16) for b in biases]
    out_bf = path_prediction_forward(embed_1, embed_2, w_bf16, b_bf16,
                                     relu_last=relu_last)
    out_bf = jax.block_until_ready(out_bf)
    ref_bf = path_prediction_reference(embed_1, embed_2, w_bf16, b_bf16,
                                       relu_last=relu_last)
    assert jnp.allclose(out_bf, ref_bf, atol=1e-1, rtol=1e-1), "mismatch (bf16)"

    print("KERNEL_OK")
</pallas_src>

<mosaic_0001>
module attributes {stable_mosaic.version = 11 : i64} {
  func.func @kernel(%arg0: memref<16x8xf32, #tpu.memory_space<vmem>>, %arg1: memref<16x8xf32, #tpu.memory_space<vmem>>, %arg2: memref<32x16xf32, #tpu.memory_space<vmem>>, %arg3: memref<32x16xf32, #tpu.memory_space<vmem>>, %arg4: memref<32x1xf32, #tpu.memory_space<vmem>>, %arg5: memref<32x32xf32, #tpu.memory_space<vmem>>, %arg6: memref<32x1xf32, #tpu.memory_space<vmem>>, %arg7: memref<16x32xf32, #tpu.memory_space<vmem>>, %arg8: memref<16x1xf32, #tpu.memory_space<vmem>>, %arg9: memref<16x8xf32, #tpu.memory_space<vmem>>) attributes {dimension_semantics = [], scalar_prefetch = 0 : i64, scratch_operands = 0 : i64, tpu.core_type = #tpu.core_type<tc>} {
    %c0 = arith.constant 0 : index
    %c0_0 = arith.constant 0 : index
    %0 = vector.load %arg2[%c0, %c0_0] : memref<32x16xf32, #tpu.memory_space<vmem>>, vector<32x16xf32>
    %c0_1 = arith.constant 0 : index
    %c0_2 = arith.constant 0 : index
    %1 = vector.load %arg3[%c0_1, %c0_2] : memref<32x16xf32, #tpu.memory_space<vmem>>, vector<32x16xf32>
    %c0_3 = arith.constant 0 : index
    %c0_4 = arith.constant 0 : index
    %2 = vector.load %arg4[%c0_3, %c0_4] : memref<32x1xf32, #tpu.memory_space<vmem>>, vector<32x1xf32>
    %c0_5 = arith.constant 0 : index
    %c0_6 = arith.constant 0 : index
    %3 = vector.load %arg0[%c0_5, %c0_6] : memref<16x8xf32, #tpu.memory_space<vmem>>, vector<16x8xf32>
    %cst = arith.constant dense<0.000000e+00> : vector<32x8xf32>
    %4 = tpu.matmul %0, %3, %cst {dimension_numbers = #tpu.dot_dimension_numbers<[1], [0], [0], [1], [0, 0, 1, 1], [], []>} : vector<32x16xf32>, vector<16x8xf32>, vector<32x8xf32> -> vector<32x8xf32>
    %c0_7 = arith.constant 0 : index
    %c0_8 = arith.constant 0 : index
    %5 = vector.load %arg1[%c0_7, %c0_8] : memref<16x8xf32, #tpu.memory_space<vmem>>, vector<16x8xf32>
    %cst_9 = arith.constant dense<0.000000e+00> : vector<32x8xf32>
    %6 = tpu.matmul %1, %5, %cst_9 {dimension_numbers = #tpu.dot_dimension_numbers<[1], [0], [0], [1], [0, 0, 1, 1], [], []>} : vector<32x16xf32>, vector<16x8xf32>, vector<32x8xf32> -> vector<32x8xf32>
    %7 = arith.addf %4, %6 : vector<32x8xf32>
    %8 = vector.broadcast %2 : vector<32x1xf32> to vector<32x8xf32>
    %9 = arith.addf %7, %8 : vector<32x8xf32>
    %cst_10 = arith.constant 0.000000e+00 : f32
    %10 = vector.broadcast %cst_10 : f32 to vector<32x8xf32>
    %11 = arith.maximumf %9, %10 : vector<32x8xf32>
    %c0_11 = arith.constant 0 : index
    %c0_12 = arith.constant 0 : index
    %12 = vector.load %arg5[%c0_11, %c0_12] : memref<32x32xf32, #tpu.memory_space<vmem>>, vector<32x32xf32>
    %c0_13 = arith.constant 0 : index
    %c0_14 = arith.constant 0 : index
    %13 = vector.load %arg6[%c0_13, %c0_14] : memref<32x1xf32, #tpu.memory_space<vmem>>, vector<32x1xf32>
    %cst_15 = arith.constant dense<0.000000e+00> : vector<32x8xf32>
    %14 = tpu.matmul %12, %11, %cst_15 {dimension_numbers = #tpu.dot_dimension_numbers<[1], [0], [0], [1], [0, 0, 1, 1], [], []>} : vector<32x32xf32>, vector<32x8xf32>, vector<32x8xf32> -> vector<32x8xf32>
    %15 = vector.broadcast %13 : vector<32x1xf32> to vector<32x8xf32>
    %16 = arith.addf %14, %15 : vector<32x8xf32>
    %cst_16 = arith.constant 0.000000e+00 : f32
    %17 = vector.broadcast %cst_16 : f32 to vector<32x8xf32>
    %18 = arith.maximumf %16, %17 : vector<32x8xf32>
    %c0_17 = arith.constant 0 : index
    %c0_18 = arith.constant 0 : index
    %19 = vector.load %arg7[%c0_17, %c0_18] : memref<16x32xf32, #tpu.memory_space<vmem>>, vector<16x32xf32>
    %c0_19 = arith.constant 0 : index
    %c0_20 = arith.constant 0 : index
    %20 = vector.load %arg8[%c0_19, %c0_20] : memref<16x1xf32, #tpu.memory_space<vmem>>, vector<16x1xf32>
    %cst_21 = arith.constant dense<0.000000e+00> : vector<16x8xf32>
    %21 = tpu.matmul %19, %18, %cst_21 {dimension_numbers = #tpu.dot_dimension_numbers<[1], [0], [0], [1], [0, 0, 1, 1], [], []>} : vector<16x32xf32>, vector<32x8xf32>, vector<16x8xf32> -> vector<16x8xf32>
    %22 = vector.broadcast %20 : vector<16x1xf32> to vector<16x8xf32>
    %23 = arith.addf %21, %22 : vector<16x8xf32>
    %cst_22 = arith.constant 0.000000e+00 : f32
    %24 = vector.broadcast %cst_22 : f32 to vector<16x8xf32>
    %25 = arith.maximumf %23, %24 : vector<16x8xf32>
    %c0_23 = arith.constant 0 : index
    %c0_24 = arith.constant 0 : index
    %26 = vector.load %arg9[%c0_23, %c0_24] : memref<16x8xf32, #tpu.memory_space<vmem>>, vector<16x8xf32>
    tpu.vector_store %arg9[%c0_23, %c0_24], %25 {strides = array<i32>} : memref<16x8xf32, #tpu.memory_space<vmem>>, vector<16x8xf32>,
    return
  }
}

</mosaic_0001>

<bundles_post_ra>
// kernel: tpu_custom_call.1
= control target key start
LH: loop header
LB: loop body
LE: loop exit
PB: predicated region body
PF: predicated region fallthrough
CT: control target
= control target key end

     0   :  { %vm48_vm0 = vcmask 130048   ;;  %v621_v3 = vmov 0   ;;  %vm299_vm1 = vcmask 261120   ;;  %vm498_vm2 = vcmask 64512   ;;  %s776_s1 = inlined_call_operand.vmem [shape: f32[16,8], index: 1, kind: input, shape index: {}]   ;;  %s777_s3 = inlined_call_operand.vmem [shape: f32[32,16], index: 3, kind: input, shape index: {}]   ;;  %s778_s0 = inlined_call_operand.vmem [shape: f32[16,8], index: 0, kind: input, shape index: {}]   ;;  %s779_s4 = inlined_call_operand.vmem [shape: f32[32,1], index: 4, kind: input, shape index: {}]   ;;  %s780_s2 = inlined_call_operand.vmem [shape: f32[32,16], index: 2, kind: input, shape index: {}]   ;;  %s781_s6 = inlined_call_operand.vmem [shape: f32[32,1], index: 6, kind: input, shape index: {}]   ;;  %s782_s8 = inlined_call_operand.vmem [shape: f32[16,1], index: 8, kind: input, shape index: {}]   ;;  %s783_s5 = inlined_call_operand.vmem [shape: f32[32,32], index: 5, kind: input, shape index: {}]   ;;  %s784_s7 = inlined_call_operand.vmem [shape: f32[16,32], index: 7, kind: input, shape index: {}]   ;;  %s785_s9 = inlined_call_operand.vmem [shape: f32[16,8], index: 9, kind: output, shape index: {}]  }
   0x1   :  { %v46_v0 = vld [vmem:[%s776_s1] sm:$0xff]  ;;  %v47_v1 = vld [vmem:[%s776_s1 + $0x8] sm:$0xff]  ;;  %619 = vset.pattern.permute.xlu0 %v621_v3  ;;  %620 = vset.pattern.permute.xlu1 %v621_v3  ;;  %v42_v10 = vld [vmem:[%s779_s4 + $0x10] sm:$0xff] }
   0x2   :  { %v36_v2 = vld [vmem:[%s777_s3] sm:$0xff]  ;;  %v590_v4 = vpack.c.bf16 %v47_v1, %v46_v0  ;;  %v45_v6 = vld [vmem:[%s778_s0 + $0x8] sm:$0xff]  ;;  %v38_v11 = vld [vmem:[%s777_s3 + $0x10] sm:$0xff]  ;;  %255 = vperm.xlu1 %620, %v42_v10  }
   0x3   :  { %549 = vmatprep.mubr.msk.f32.mxu0 %vm48_vm0, %v36_v2  ;;  %v44_v5 = vld [vmem:[%s778_s0] sm:$0xff]  ;;  %v37_v8 = vld [vmem:[%s777_s3 + $0x8] sm:$0xff]  ;;  %v43_v13 = vld [vmem:[%s779_s4 + $0x18] sm:$0xff] }
   0x4   :  { %v594_v7 = vpack.c.bf16 %v45_v6, %v44_v5  ;;  %591 = vmatprep.subr.bf16.mxu0 %v590_v4  ;;  %v40_v9 = vld [vmem:[%s779_s4] sm:$0xff]  ;;  %v41_v12 = vld [vmem:[%s779_s4 + $0x8] sm:$0xff]  ;;  %v39_v14 = vld [vmem:[%s777_s3 + $0x18] sm:$0xff] }
   0x5   :  { %593 = vmatpush3.bf16.msra.mxu0 %v590_v4  ;;  %245 = vperm.xlu0 %619, %v40_v9   ;;  %v32_v15 = vld [vmem:[%s780_s2] sm:$0xff]  ;;  %v276_v17 = vld [vmem:[%s781_s6 + $0x8] sm:$0xff]  ;;  %v34_v19 = vld [vmem:[%s780_s2 + $0x10] sm:$0xff] }
   0x6   :  { %595 = vmatprep.subr.bf16.mxu0 %v594_v7  ;;  %260 = vperm.xlu1 %620, %v43_v13   ;;  %v275_v16 = vld [vmem:[%s781_s6] sm:$0xff]  ;;  %v33_v18 = vld [vmem:[%s780_s2 + $0x8] sm:$0xff]  ;;  %v277_v20 = vld [vmem:[%s781_s6 + $0x10] sm:$0xff] }
   0x7   :  { %v278_v21 = vld [vmem:[%s781_s6 + $0x18] sm:$0xff]  ;;  %v403_v23 = vld [vmem:[%s782_s8] sm:$0xff]  ;;  %v404_v24 = vld [vmem:[%s782_s8 + $0x8] sm:$0xff] }
   0x8   :  { %550 = vmatmul.mubr.msk.f32.vlgmr.msra.gmra.mrb[0].mxu0 %vm48_vm0, %v37_v8  ;;  %v35_v22 = vld [vmem:[%s780_s2 + $0x18] sm:$0xff]  ;;  %v271_v25 = vld [vmem:[%s783_s5] sm:$0xff]  ;;  %v272_v44 = vld [vmem:[%s783_s5 + $0x8] sm:$0xff] }
   0x9   :  { %597 = vmatpush3.bf16.msra.mxu0 %v594_v7  ;;  %552 = vmatprep.mubr.msk.f32.mxu0 %vm48_vm0, %v38_v11  ;;  %v273_v45 = vld [vmem:[%s783_s5 + $0x10] sm:$0xff]  ;;  %v274_v46 = vld [vmem:[%s783_s5 + $0x18] sm:$0xff]  ;;  %v401_v47 = vld [vmem:[%s784_s7] sm:$0xff] }
   0xa   :  { %250 = vperm.xlu0 %619, %v41_v12   ;;  %286 = vperm.xlu1 %620, %v276_v17   ;;  %v402_v2 = vld [vmem:[%s784_s7 + $0x8] sm:$0xff] }
   0xb   :  { %573 = vmatprep.mubr.msk.f32.mxu1 %vm299_vm1, %v271_v25 }
   0xc   :  { %553 = vmatmul.mubr.msk.f32.gmra.mrb[2].mxu0 %vm48_vm0, %v39_v14 }
   0xd   :  { %559 = vmatprep.mubr.msk.f32.mxu0 %vm48_vm0, %v32_v15 }
   0xe   :  { %281 = vperm.xlu0 %619, %v275_v16   ;;  %296 = vperm.xlu1 %620, %v278_v21  }
  0x10   :  { %560 = vmatmul.mubr.msk.f32.vlgmr.msra.gmra.mrb[0].mxu0 %vm48_vm0, %v33_v18 }
  0x11   :  { %562 = vmatprep.mubr.msk.f32.mxu0 %vm48_vm0, %v34_v19 }
  0x12   :  { %291 = vperm.xlu0 %619, %v277_v20   ;;  %412 = vperm.xlu1 %620, %v404_v24  }
  0x14   :  { %563 = vmatmul.mubr.msk.f32.gmra.mrb[2].mxu0 %vm48_vm0, %v35_v22 }
  0x16   :  { %407 = vperm.xlu0 %619, %v403_v23  }
  0x81   :  { %v256_v27 = vpop.permute.xlu1 %255 }
  0x84   :  { %v246_v26 = vpop.permute.xlu0 %245 }
  0x85   :  { %v261_v34 = vpop.permute.xlu1 %260 }
  0x89   :  { %v251_v28 = vpop.permute.xlu0 %250  ;;  %v287_v48 = vpop.permute.xlu1 %286 }
  0x8d   :  { %v282_v49 = vpop.permute.xlu0 %281  ;;  %v297_v55 = vpop.permute.xlu1 %296 }
  0x91   :  { %v292_v58 = vpop.permute.xlu0 %291  ;;  %v413_v3 = vpop.permute.xlu1 %412 }
  0x95   :  { %v408_v5 = vpop.permute.xlu0 %407 }
  0xe3   :  { %v561_v29 = vpop.f32.mrb[0].mxu0 }
  0xe4   :  { %v264_v30 = vadd.f32 %v561_v29, %v251_v28  ;;  %v224_v31 = vpop.f32.mrb[1].mxu0 }
  0xe5   :  { %v263_v32 = vadd.f32 %v246_v26, %v224_v31 }
  0xe6   :  { %v268_v33 = vmax.f32 %v264_v30, 0.0 }
  0xe7   :  { %v267_v35 = vmax.f32 %v263_v32, 0.0  ;;  %v564_v36 = vpop.f32.mrb[2].mxu0 }
  0xe8   :  { %v266_v37 = vadd.f32 %v564_v36, %v261_v34  ;;  %v234_v38 = vpop.f32.mrb[3].mxu0 }
  0xe9   :  { %v265_v39 = vadd.f32 %v256_v27, %v234_v38  ;;  %v598_v40 = vpack.c.bf16 %v268_v33, %v267_v35 }
  0xea   :  { %v270_v41 = vmax.f32 %v266_v37, 0.0 }
  0xeb   :  { %v269_v42 = vmax.f32 %v265_v39, 0.0  ;;  %599 = vmatprep.subr.bf16.mxu1 %v598_v40 }
  0xec   :  { %601 = vmatpush3.bf16.msra.mxu1 %v598_v40 }
  0xed   :  { %v602_v43 = vpack.c.bf16 %v270_v41, %v269_v42 }
  0xef   :  { %603 = vmatprep.subr.bf16.mxu1 %v602_v43 }
  0xf0   :  { %605 = vmatpush3.bf16.msra.mxu1 %v602_v43 }
  0xf3   :  { %574 = vmatmul.mubr.msk.f32.vlgmr.msra.gmra.mrb[0].mxu1 %vm299_vm1, %v272_v44 }
  0xf4   :  { %576 = vmatprep.mubr.msk.f32.mxu1 %vm299_vm1, %v273_v45 }
  0xf7   :  { %577 = vmatmul.mubr.msk.f32.gmra.mrb[2].mxu1 %vm299_vm1, %v274_v46 }
  0xf8   :  { %587 = vmatprep.mubr.msk.f32.mxu1 %vm299_vm1, %v401_v47 }
 0x1c6   :  { %v575_v50 = vpop.f32.mrb[0].mxu1 }
 0x1c7   :  { %v384_v51 = vadd.f32 %v575_v50, %v287_v48  ;;  %v378_v52 = vpop.f32.mrb[1].mxu1 }
 0x1c8   :  { %v379_v53 = vadd.f32 %v378_v52, %v282_v49 }
 0x1c9   :  { %v398_v54 = vmax.f32 %v384_v51, 0.0 }
 0x1ca   :  { %v397_v56 = vmax.f32 %v379_v53, 0.0  ;;  %v578_v57 = vpop.f32.mrb[2].mxu1 }
 0x1cb   :  { %v394_v59 = vadd.f32 %v578_v57, %v297_v55  ;;  %v388_v60 = vpop.f32.mrb[3].mxu1 }
 0x1cc   :  { %v606_v61 = vpack.c.bf16 %v398_v54, %v397_v56  ;;  %v389_v62 = vadd.f32 %v388_v60, %v292_v58 }
 0x1cd   :  { %v400_v63 = vmax.f32 %v394_v59, 0.0 }
 0x1ce   :  { %v399_v0 = vmax.f32 %v389_v62, 0.0  ;;  %607 = vmatprep.subr.bf16.mxu1 %v606_v61 }
 0x1cf   :  { %609 = vmatpush3.bf16.msra.mxu1 %v606_v61 }
 0x1d0   :  { %v610_v1 = vpack.c.bf16 %v400_v63, %v399_v0 }
 0x1d2   :  { %611 = vmatprep.subr.bf16.mxu1 %v610_v1 }
 0x1d3   :  { %613 = vmatpush3.bf16.msra.mxu1 %v610_v1 }
 0x1d6   :  { %588 = vmatmul.mubr.msk.f32.vlgmr.msra.gmra.mrb[4].mxu1 %vm299_vm1, %v402_v2 }
 0x2a9   :  { %v589_v4 = vpop.f32.mrb[4].mxu1 }
 0x2aa   :  { %v493_v6 = vadd.f32 %v589_v4, %v413_v3  ;;  %v487_v7 = vpop.f32.mrb[5].mxu1 }
 0x2ab   :  { %v488_v8 = vadd.f32 %v487_v7, %v408_v5 }
 0x2ac   :  { %v497_v9 = vmax.f32 %v493_v6, 0.0 }
 0x2ad   :  { %v496_v10 = vmax.f32 %v488_v8, 0.0 }
 0x2ae   :  { %500 = vst.msk [vmem:[%s785_s9 + $0x8] sm:$0xff] %vm498_vm2, %v497_v9 }
 0x2af   :  { %499 = vst.msk [vmem:[%s785_s9] sm:$0xff] %vm498_vm2, %v496_v10 }

</bundles_post_ra>
